<compile_context>
chip_gen: v6e
topology: v6e:2x2x1
jax: 0.10.0
libtpu: 0.0.40
codegen_flags: <defaults>
</compile_context>

<pallas_src>
import math

import jax
import jax.numpy as jnp
from jax.experimental import pallas as pl
from jax.experimental.pallas import tpu as pltpu


def _rope_cache_kernel(scale_ref, phase_ref, cos_ref, sin_ref):
    # cos_ref / sin_ref block: (tile_rows, lanes) where lanes = P*dim (>=128, lane-dense)
    # scale_ref / phase_ref block: (1, lanes), f32
    tile_rows, lanes = cos_ref.shape
    i = pl.program_id(0)

    # Global slab-row index for every element of this tile (int math is exact).
    row = jax.lax.broadcasted_iota(jnp.int32, (tile_rows, lanes), 0)
    pos_row = (row + i * tile_rows).astype(jnp.float32)

    # emb[r, l] = (r*P + lane_group(l)) * inv_freq_full(l)
    #           = r * (P*inv_freq_packed)[l] + (lane_group*inv_freq_packed)[l]
    emb = pos_row * scale_ref[...] + phase_ref[...]

    cos_ref[...] = jnp.cos(emb).astype(cos_ref.dtype)
    sin_ref[...] = jnp.sin(emb).astype(sin_ref.dtype)


def build_rope_cache(dim: int,
                     max_position_embeddings: int,
                     base: float = 10000.0,
                     dtype=jnp.float32,
                     max_rows_per_tile: int = 512):
    """Builds cos/sin caches of shape (max_position_embeddings, dim) with Pallas.

    Internally the cache is built as a lane-dense slab of shape
    (padded_pos // P, P*dim) with P*dim a multiple of 128, then reshaped back.
    """
    assert dim % 2 == 0

    # Lane packing: smallest P with (P*dim) % 128 == 0.
    P = 128 // math.gcd(dim, 128)
    lanes = P * dim

    # Pad the cache length so the slab has a sublane count that is a multiple of 8.
    row_quantum = 8 * P
    padded_pos = ((max_position_embeddings + row_quantum - 1) // row_quantum) * row_quantum
    slab_rows = padded_pos // P

    # Pick the largest tile (multiple of 8, divides slab_rows, <= cap). Keep >= 2
    # grid steps when the slab is big enough so both v7x TensorCores get work.
    if slab_rows >= 16:
        cap = min(max_rows_per_tile, slab_rows // 2)
    else:
        cap = slab_rows
    cap = max(8, (cap // 8) * 8)
    tile_rows = 8
    for cand in range(8, cap + 1, 8):
        if slab_rows % cand == 0:
            tile_rows = cand

    # Host-side precompute: duplicated inv_freq, tiled over the P lane groups,
    # plus the per-lane-group phase offset. No concatenates inside the kernel.
    inv_freq = 1.0 / (base ** (jnp.arange(0, dim, 2, dtype=jnp.float32) / dim))   # (dim//2,)
    inv_full = jnp.concatenate([inv_freq, inv_freq])                              # (dim,)
    inv_packed = jnp.tile(inv_full, P)                                            # (lanes,)
    lane_group = jnp.repeat(jnp.arange(P, dtype=jnp.float32), dim)                # (lanes,)
    scale = (jnp.float32(P) * inv_packed).reshape(1, lanes)
    phase = (lane_group * inv_packed).reshape(1, lanes)

    grid = (slab_rows // tile_rows,)
    out_shape = (
        jax.ShapeDtypeStruct((slab_rows, lanes), dtype),
        jax.ShapeDtypeStruct((slab_rows, lanes), dtype),
    )

    cos_slab, sin_slab = pl.pallas_call(
        _rope_cache_kernel,
        out_shape=out_shape,
        grid_spec=pltpu.PrefetchScalarGridSpec(
            num_scalar_prefetch=0,
            grid=grid,
            in_specs=[
                pl.BlockSpec((1, lanes), lambda i: (0, 0)),
                pl.BlockSpec((1, lanes), lambda i: (0, 0)),
            ],
            out_specs=[
                pl.BlockSpec((tile_rows, lanes), lambda i: (i, 0)),
                pl.BlockSpec((tile_rows, lanes), lambda i: (i, 0)),
            ],
        ),
        compiler_params=pltpu.CompilerParams(
            dimension_semantics=("parallel",)),
    )(scale, phase)

    # Unpack the lane-dense slab back to (positions, dim) and drop padding rows.
    cos_cached = cos_slab.reshape(padded_pos, dim)[:max_position_embeddings]
    sin_cached = sin_slab.reshape(padded_pos, dim)[:max_position_embeddings]
    return cos_cached, sin_cached


class TimeMoeRotaryEmbeddingPallas:
    """JAX/Pallas port of TimeMoeRotaryEmbedding (cos/sin cache builder)."""

    def __init__(self, dim, max_position_embeddings=10000, base=10000.0,
                 dtype=jnp.float32):
        self.dim = dim
        self.max_position_embeddings = max_position_embeddings
        self.base = base
        self.max_seq_len_cached = max_position_embeddings
        # Initial cache in the "default dtype" (mirrors torch.get_default_dtype()).
        self.cos_cached, self.sin_cached = build_rope_cache(
            dim, max_position_embeddings, base, dtype=dtype)

    def __call__(self, x, seq_len: int = 0):
        if seq_len > self.max_seq_len_cached:
            # Mirrors _set_cos_sin_cache(seq_len, device=x.device, dtype=x.dtype):
            # rebuild directly in the model dtype so the kernel stores are narrow.
            self.max_seq_len_cached = seq_len
            self.cos_cached, self.sin_cached = build_rope_cache(
                self.dim, seq_len, self.base, dtype=x.dtype)
        # astype is a no-op when dtypes already match.
        return (self.cos_cached[:seq_len].astype(x.dtype),
                self.sin_cached[:seq_len].astype(x.dtype))


if __name__ == "__main__":
    # Small, module-consistent shapes: head dim 32, cache length 64, seq_len 16.
    dim = 32
    max_pos = 64
    seq_len = 16

    key = jax.random.PRNGKey(0)
    # x: (batch, seq, dim) — only its dtype matters to forward, as in PyTorch.
    x = jax.random.normal(key, (2, seq_len, dim), dtype=jnp.float32)

    rope = TimeMoeRotaryEmbeddingPallas(dim, max_position_embeddings=max_pos)
    cos, sin = rope(x, seq_len=seq_len)
    cos = jax.block_until_ready(cos)
    sin = jax.block_until_ready(sin)

    # Pure-JAX reference (same math as the PyTorch module).
    inv_freq = 1.0 / (10000.0 ** (jnp.arange(0, dim, 2, dtype=jnp.float32) / dim))
    t = jnp.arange(seq_len, dtype=jnp.float32)
    freqs = jnp.outer(t, inv_freq)
    emb = jnp.concatenate([freqs, freqs], axis=-1)

    assert cos.shape == (seq_len, dim) and sin.shape == (seq_len, dim)
    assert cos.dtype == x.dtype and sin.dtype == x.dtype
    assert jnp.allclose(cos, jnp.cos(emb), atol=1e-5)
    assert jnp.allclose(sin, jnp.sin(emb), atol=1e-5)

    # Also check the full cached table against the reference over all positions.
    t_full = jnp.arange(max_pos, dtype=jnp.float32)
    emb_full = jnp.concatenate([jnp.outer(t_full, inv_freq)] * 2, axis=-1)
    assert jnp.allclose(rope.cos_cached, jnp.cos(emb_full), atol=1e-5)
    assert jnp.allclose(rope.sin_cached, jnp.sin(emb_full), atol=1e-5)

    print("KERNEL_OK")
</pallas_src>

<mosaic_0001>
module attributes {stable_mosaic.version = 11 : i64} {
  func.func @_rope_cache_kernel(%arg0: i32, %arg1: memref<1x128xf32, #tpu.memory_space<vmem>>, %arg2: memref<1x128xf32, #tpu.memory_space<vmem>>, %arg3: memref<8x128xf32, #tpu.memory_space<vmem>>, %arg4: memref<8x128xf32, #tpu.memory_space<vmem>>) attributes {dimension_semantics = [#tpu.dimension_semantics<parallel>], iteration_bounds = array<i64: 2>, scalar_prefetch = 0 : i64, scratch_operands = 0 : i64, tpu.core_type = #tpu.core_type<tc>, window_params = [{pipeline_mode = #tpu.pipeline_mode<synchronous>, transform_indices = @transform_0, window_bounds = array<i64: 1, 128>}, {pipeline_mode = #tpu.pipeline_mode<synchronous>, transform_indices = @transform_1, window_bounds = array<i64: 1, 128>}, {transform_indices = @transform_2, window_bounds = array<i64: 8, 128>}, {transform_indices = @transform_3, window_bounds = array<i64: 8, 128>}]} {
    %0 = tpu.iota {dimensions = array<i32: 0>} : vector<8x128xi32>
    %c8_i32 = arith.constant 8 : i32
    %1 = arith.muli %arg0, %c8_i32 : i32
    %2 = vector.broadcast %1 : i32 to vector<8x128xi32>
    %3 = arith.addi %0, %2 : vector<8x128xi32>
    %4 = arith.sitofp %3 : vector<8x128xi32> to vector<8x128xf32>
    %c0 = arith.constant 0 : index
    %c0_0 = arith.constant 0 : index
    %5 = vector.load %arg1[%c0, %c0_0] : memref<1x128xf32, #tpu.memory_space<vmem>>, vector<1x128xf32>
    %6 = vector.broadcast %5 : vector<1x128xf32> to vector<8x128xf32>
    %7 = arith.mulf %4, %6 : vector<8x128xf32>
    %c0_1 = arith.constant 0 : index
    %c0_2 = arith.constant 0 : index
    %8 = vector.load %arg2[%c0_1, %c0_2] : memref<1x128xf32, #tpu.memory_space<vmem>>, vector<1x128xf32>
    %9 = vector.broadcast %8 : vector<1x128xf32> to vector<8x128xf32>
    %10 = arith.addf %7, %9 : vector<8x128xf32>
    %11 = math.cos %10 : vector<8x128xf32>
    %c0_3 = arith.constant 0 : index
    %c0_4 = arith.constant 0 : index
    %12 = vector.load %arg3[%c0_3, %c0_4] : memref<8x128xf32, #tpu.memory_space<vmem>>, vector<8x128xf32>
    tpu.vector_store %arg3[%c0_3, %c0_4], %11 {strides = array<i32>} : memref<8x128xf32, #tpu.memory_space<vmem>>, vector<8x128xf32>,
    %13 = math.sin %10 : vector<8x128xf32>
    %c0_5 = arith.constant 0 : index
    %c0_6 = arith.constant 0 : index
    %14 = vector.load %arg4[%c0_5, %c0_6] : memref<8x128xf32, #tpu.memory_space<vmem>>, vector<8x128xf32>
    tpu.vector_store %arg4[%c0_5, %c0_6], %13 {strides = array<i32>} : memref<8x128xf32, #tpu.memory_space<vmem>>, vector<8x128xf32>,
    return
  }
  func.func @transform_0(%arg0: i32) -> (i32, i32) {
    %c0_i32 = arith.constant 0 : i32
    %c0_i32_0 = arith.constant 0 : i32
    %c0_i32_1 = arith.constant 0 : i32
    return %c0_i32, %c0_i32_0 : i32, i32
  }
  func.func @transform_1(%arg0: i32) -> (i32, i32) {
    %c0_i32 = arith.constant 0 : i32
    %c0_i32_0 = arith.constant 0 : i32
    %c0_i32_1 = arith.constant 0 : i32
    return %c0_i32, %c0_i32_0 : i32, i32
  }
  func.func @transform_2(%arg0: i32) -> (i32, i32) {
    %c0_i32 = arith.constant 0 : i32
    %c0_i32_0 = arith.constant 0 : i32
    return %arg0, %c0_i32 : i32, i32
  }
  func.func @transform_3(%arg0: i32) -> (i32, i32) {
    %c0_i32 = arith.constant 0 : i32
    %c0_i32_0 = arith.constant 0 : i32
    return %arg0, %c0_i32 : i32, i32
  }
}

</mosaic_0001>

<bundles_post_ra>
// kernel: tpu_custom_call.1
= control target key start
LH: loop header
LB: loop body
LE: loop exit
PB: predicated region body
PF: predicated region fallthrough
CT: control target
= control target key end

     0   :  { %9 = vsyncpa [#allocation3], 0  ;;  %s940_s0 = inlined_call_operand.hbm [shape: f32[1,128], index: 0, kind: input, shape index: {}]   ;;  %s941_s1 = inlined_call_operand.vmem [shape: f32[1,128], index: 1, kind: input, shape index: {}]   ;;  %s942_s2 = inlined_call_operand.hbm [shape: f32[16,128], index: 2, kind: output, shape index: {0}]   ;;  %s943_s3 = inlined_call_operand.hbm [shape: f32[16,128], index: 3, kind: output, shape index: {1}]  }
   0x1   :  { %10 = vsyncpa [#allocation4], 0 }
   0x2   :  { %12 = vsyncpa [#allocation4 + $0x1], 0 }
   0x3   :  { %13 = vsyncpa [#allocation7], 0 }
   0x4   :  { %15 = vsyncpa [#allocation7 + $0x1], 0  ;;  %s771_s12 = smov 0   ;;  %s773_s13 = smov 0  }
   0x5   :  { %s775_s14 = smov 0   ;;  %s777_s15 = smov 0  }
   0x6 LB: > { %s792_s16 = sadd.s32 4294967295, %s740_s15   ;;  %s527_s17 = sadd.s32 4294967294, %s740_s15   ;;  %s740_s15 = sphi %s777_s15, %s950_s15   ;;  %s736_s14 = sphi %s775_s14, %s949_s14   ;;  %s732_s13 = sphi %s773_s13, %s948_s13   ;;  %s728_s12 = sphi %s771_s12, %s947_s12  }
   0x7   : > { %s796_s18 = sadd.s32 1, %s740_s15   ;;  %s70_s19 = sadd.s32 1, %s736_s14 }
   0x8   : > { %s67_s20 = ssub.s32 %s740_s15, %s796_s18  ;;  %p80_p0 = scmp.ne.s32.totalorder %s736_s14, %s732_s13 }
   0x9   : > { %p68_p1 = scmp.eq.s32.totalorder %s67_s20, 0  ;;  %p81_p2 = scmp.eq.s32.totalorder %s792_s16, 1 }
   0xa   : > { %p86_p3 = scmp.ne.s32.totalorder %s732_s13, %s728_s12  ;;  %p87_p4 = scmp.eq.s32.totalorder %s527_s17, 1 }
   0xb   : > { %s807_s21 = scalar_select %p68_p1, %s736_s14, %s70_s19  }
   0xc   : > { %p809_p5 = por %p81_p2, %p80_p0  ;;  %p813_p6 = por %p87_p4, %p86_p3 }
   0xd   : > { %p528_p7 = scmp.ge.s32.totalorder %s740_s15, 1  ;;  %p120_p8 = scmp.lt.s32.totalorder %s740_s15, 3 }
   0xe   : > { %p574_p9 = scmp.eq.s32.totalorder %s792_s16, 0  ;;  %s742_s25 = smov [#allocation2]  }
   0xf   : > { %p820_p10 = pnand %p528_p7, %p120_p8  ;;  %s133_s26 = sshll.u32 %s742_s25, 4  ;;  %s134_s26 = int_to_ptr.vmem [resolvable:$true] %s133_s26 }
  0x10   : > { %s631_s27 = scalar_lea.vmem %s134_s26, 16  ;;  %s638_s28 = scalar_lea.vmem %s134_s26, 32 }
  0x11   : > { %p563_p11 = pneg %p820_p10  ;;  %p632_p0 = scmp.ne.s32.totalorder %s134_s26, %s631_s27 }
  0x12   : > { %p639_p3 = scmp.lt.s32.totalorder %s134_s26, %s134_s26  ;;  %p640_p4 = scmp.lt.s32.totalorder %s638_s28, %s631_s27 }
  0x13   : > { %p564_p12 = pnand %p574_p9, %p563_p11 }
  0x14   : > { %p641_p7 = por %p640_p4, %p639_p3 }
  0x15   : > { %p622_p13 = pneg %p564_p12 }
  0x17   : > { %p634_p1 = pnand %p632_p0, %p622_p13 }
  0x19   : > { %p635_p2 = pneg %p634_p1 }
  0x1b   : > { %p642_p8 = pnand %p641_p7, %p635_p2 }
  0x1d   : > { %645 = shalt.err (!%p642_p8)
}
  0x1e   : > { %566 = dma.hbm_to_vmem [thread:$0]  (!%p564_p12), %s940_s0, 16, %s134_s26, [#allocation3]  }
  0x1f   : > { %149 = sbr.rel (%p820_p10) target bundleno = 167 (0xa7), region = 28 }
  0x24   : > { %715 = dma.done.wait (%p574_p9), [#allocation3], 16  }
  0x25   : > { %717 = vsyncadd (%p574_p9), [#allocation3], 4294967280  ;;  %v173_v0 = vlaneseq  ;;  %s534_s4 = sshll.u32 %s792_s16, 3  ;;  %v535_v5 = vld [vmem:[#allocation2] ss:$0 sm:$0xff]  ;;  %s862_s7 = sand.u32 1, %s732_s13  }
  0x26   : > { %v176_v1 = vstv %s534_s4  ;;  %v536_v6 = vld [vmem:[%s941_s1] ss:$0 sm:$0xff]  ;;  %v743_v20 = vmov 683565275   ;;  %v744_v22 = vmov 2475754826  }
  0x27   : > { %v174_v2 = vshrl.u32 %v173_v0, 7  ;;  %v745_v24 = vmov 2131351028   ;;  %v746_v26 = vmov 2102212464   ;;  %s532_s8 = sshll.u32 %s862_s7, 3 }
  0x28   : > { %v747_v28 = vmov 920167782   ;;  %v748_v35 = vmov 1326507024   ;;  %s165_s9 = scalar_lea.vmem [#allocation5], %s532_s8  ;;  %s172_s11 = scalar_lea.vmem [#allocation6], %s532_s8 }
  0x29   : > { %v177_v3 = vadd.s32 %v176_v1, %v174_v2  ;;  %s423_s10 = sshll.u32 %s165_s9, 4  ;;  %s436_s17 = sshll.u32 %s172_s11, 4  ;;  %s867_s10 = int_to_ptr.vmem [resolvable:$true] %s423_s10  ;;  %s869_s17 = int_to_ptr.vmem [resolvable:$true] %s436_s17 }
  0x2a   : > { %s547_s19 = sshll.u32 %s792_s16, 7  ;;  %s405_s28 = scalar_lea.sflag [#allocation4], %s862_s7 }
  0x2b   : > { %v178_v4 = vcvt.s32.f32 %v177_v3  ;;  %s874_s16 = scalar_lea.hbm %s942_s2, %s547_s19  ;;  %s879_s27 = scalar_lea.hbm %s943_s3, %s547_s19 }
  0x2c   : > { %s646_s29 = scalar_lea.vmem %s867_s10, 128  ;;  %s749_s30 = smov [#allocation5]  }
  0x2d   : > { %v186_v7 = vmul.f32 %v535_v5, %v178_v4  ;;  %p647_p9 = scmp.ne.s32.totalorder %s867_s10, %s646_s29  ;;  %s650_s4 = sshll.u32 %s749_s30, 4  ;;  %s651_s4 = int_to_ptr.vmem [resolvable:$false] %s650_s4 }
  0x2e   : > { %s652_s5 = scalar_lea.vmem %s651_s4, 256  ;;  %p653_p12 = scmp.lt.s32.totalorder %s867_s10, %s651_s4 }
  0x2f   : > { %v841_v8 = vadd.f32 %v536_v6, %v186_v7  ;;  %p648_p10 = pnand %p647_p9, %p809_p5  ;;  %p654_p13 = scmp.lt.s32.totalorder %s652_s5, %s646_s29 }
  0x31   : > { %v198_v9 = vand.u32 2139095040, %v841_v8  ;;  %v195_v11 = vand.u32 2147483647, %v841_v8  ;;  %vm197_vm7 = vcmp.lt.s32.totalorder %v841_v8, 0  ;;  %vm287_vm15 = vweird.f32 %v841_v8  ;;  %p649_p11 = pneg %p648_p10  ;;  %p655_p0 = por %p654_p13, %p653_p12 }
  0x33   : > { %v199_v10 = vshrl.u32 %v198_v9, 23  ;;  %v202_v14 = vand.u32 8388607, %v195_v11  ;;  %vm196_vm8 = vcmp.le.f32.partialorder %v195_v11, 0.7853982  ;;  %p656_p1 = pnand %p655_p0, %p649_p11 }
  0x35   : > { %v537_v12 = vadd.s32 4294967169, %v199_v10  ;;  %v203_v17 = vor.u32 8388608, %v202_v14 }
  0x37   : > { %v205_v13 = vadd.s32 1, %v537_v12  ;;  %v243_v37 = vshll.u32 %v203_v17, 8 }
  0x39   : > { %vm206_vm0 = vcmp.gt.s32.totalorder %v205_v13, 0 }
  0x3a   : > { %v207_v15 = vsel %vm206_vm0, %v205_v13, 0 }
  0x3b   : > { %v209_v16 = vand.u32 31, %v207_v15  ;;  %v208_v18 = vshrl.u32 %v207_v15, 5 }
  0x3d   : > { %v210_v19 = vsub.s32 32, %v209_v16  ;;  %v212_v21 = vshll.u32 %v743_v20, %v209_v16  ;;  %v215_v23 = vshll.u32 %v744_v22, %v209_v16  ;;  %v218_v25 = vshll.u32 %v745_v24, %v209_v16 }
  0x3e   : > { %v221_v27 = vshll.u32 %v746_v26, %v209_v16  ;;  %v224_v29 = vshll.u32 %v747_v28, %v209_v16  ;;  %vm227_vm1 = vcmp.lt.s32.totalorder %v208_v18, 1  ;;  %vm230_vm2 = vcmp.lt.s32.totalorder %v208_v18, 4 }
  0x3f   : > { %v211_v30 = vshrl.u32 %v743_v20, %v210_v19  ;;  %v213_v31 = vshrl.u32 %v744_v22, %v210_v19  ;;  %v216_v32 = vshrl.u32 %v745_v24, %v210_v19  ;;  %v219_v33 = vshrl.u32 %v746_v26, %v210_v19 }
  0x40   : > { %v222_v34 = vshrl.u32 %v747_v28, %v210_v19  ;;  %v225_v36 = vshrl.u32 %v748_v35, %v210_v19  ;;  %vm228_vm3 = vcmp.lt.s32.totalorder %v208_v18, 2  ;;  %vm229_vm4 = vcmp.lt.s32.totalorder %v208_v18, 3 }
  0x41   : > { %v214_v38 = vor.u32 %v213_v31, %v212_v21  ;;  %v217_v39 = vor.u32 %v216_v32, %v215_v23  ;;  %v220_v40 = vor.u32 %v219_v33, %v218_v25 }
  0x42   : > { %v223_v41 = vor.u32 %v222_v34, %v221_v27  ;;  %v226_v42 = vor.u32 %v225_v36, %v224_v29 }
  0x43   : > { %v231_v43 = vsel %vm227_vm1, %v211_v30, %v214_v38  ;;  %v232_v44 = vsel %vm230_vm2, %v220_v40, 2102212464  ;;  %v235_v45 = vsel %vm227_vm1, %v214_v38, %v217_v39  ;;  %v239_v46 = vsel %vm227_vm1, %v217_v39, %v220_v40 }
  0x44   : > { %v233_v47 = vsel %vm229_vm4, %v217_v39, %v232_v44  ;;  %v236_v48 = vsel %vm230_vm2, %v223_v41, 920167782  ;;  %v240_v49 = vsel %vm230_vm2, %v226_v42, 1326507024 }
  0x45   : > { %v237_v50 = vsel %vm229_vm4, %v220_v40, %v236_v48  ;;  %v241_v51 = vsel %vm229_vm4, %v223_v41, %v240_v49  ;;  %v234_v52 = vsel %vm228_vm3, %v231_v43, %v233_v47 }
  0x46   : > { %v238_v53 = vsel %vm228_vm3, %v235_v45, %v237_v50  ;;  %v242_v54 = vsel %vm228_vm3, %v239_v46, %v241_v51  ;;  %v250_v59 = vmul.u32 %v243_v37, %v234_v52 }
  0x47   : > { %v847_v55 = vmul.u32.u64.low %v243_v37, %v242_v54  ;;  %v848_v56 = vmul.u32.u64.high %v243_v37, %v242_v54, %v847_v55  ;;  %v850_v57 = vmul.u32.u64.low %v243_v37, %v238_v53  ;;  %v851_v58 = vmul.u32.u64.high %v243_v37, %v238_v53, %v850_v57 }
  0x49   : > { %vm252_vm5 = vc.u32 %v848_v56, %v850_v57  ;;  %v253_v60 = vadd.s32 1, %v851_v58  ;;  %v251_v7 = vadd.s32 %v850_v57, %v848_v56 }
  0x4b   : > { %v254_v61 = vsel %vm252_vm5, %v253_v60, %v851_v58 }
  0x4c   : > { %v255_v62 = vadd.s32 %v254_v61, %v250_v59 }
  0x4e   : > { %v256_v63 = vadd.s32 536870912, %v255_v62 }
  0x50   : > { %v257_v0 = vshrl.u32 %v256_v63, 30 }
  0x52   : > { %v258_v1 = vshll.u32 %v257_v0, 30  ;;  %v281_v22 = vsub.s32 4, %v257_v0 }
  0x54   : > { %v259_v2 = vsub.s32 %v255_v62, %v258_v1  ;;  %v282_v25 = vsel %vm197_vm7, %v281_v22, %v257_v0 }
  0x55   : > { %v284_v27 = vsel %vm196_vm8, 0, %v282_v25 }
  0x56   : > { %v261_v3 = vsub.s32 0, %v259_v2  ;;  %v392_v28 = vadd.s32 3, %v284_v27  ;;  %v288_v29 = vand.u32 3, %v284_v27 }
  0x58   : > { %v538_v4 = vmin.u32 %v261_v3, %v259_v2  ;;  %v393_v30 = vand.u32 3, %v392_v28  ;;  %vm293_vm9 = vcmp.eq.s32.totalorder %v288_v29, 2  ;;  %vm290_vm11 = vcmp.eq.s32.totalorder %v288_v29, 0 }
  0x59   : > { %vm289_vm13 = vcmp.lt.s32.totalorder %v288_v29, 2 }
  0x5a   : > { %v263_v5 = vclz %v538_v4  ;;  %vm398_vm10 = vcmp.eq.s32.totalorder %v393_v30, 2  ;;  %vm395_vm12 = vcmp.eq.s32.totalorder %v393_v30, 0  ;;  %vm394_vm14 = vcmp.lt.s32.totalorder %v393_v30, 2 }
  0x5c   : > { %v539_v6 = vadd.s32 4294967294, %v263_v5 }
  0x5e   : > { %vm540_vm6 = vcmp.lt.s32.totalorder %v539_v6, 0 }
  0x5f   : > { %v266_v9 = vsel %vm540_vm6, 0, %v539_v6 }
  0x60   : > { %v267_v10 = vsub.s32 32, %v266_v9  ;;  %v268_v12 = vshll.u32 %v259_v2, %v266_v9  ;;  %v271_v13 = vsub.s32 4294967266, %v266_v9 }
  0x62   : > { %v269_v14 = vshrl.u32 %v251_v7, %v267_v10  ;;  %v272_v15 = vadd.s32 127, %v271_v13 }
  0x64   : > { %v270_v16 = vor.u32 %v269_v14, %v268_v12  ;;  %v273_v17 = vshll.u32 %v272_v15, 23 }
  0x66   : > { %v274_v18 = vor.u32 4788187, %v273_v17  ;;  %v277_v19 = vcvt.s32.f32 %v270_v16 }
  0x68   : > { %v275_v20 = vand.u32 2147483647, %v274_v18 }
  0x6a   : > { %v278_v21 = vmul.f32 %v277_v19, %v275_v20 }
  0x6c   : > { %v279_v23 = vxor.u32 2147483648, %v278_v21 }
  0x6e   : > { %v280_v24 = vsel %vm197_vm7, %v279_v23, %v278_v21 }
  0x6f   : > { %v283_v26 = vsel %vm196_vm8, %v841_v8, %v280_v24 }
  0x70   : > { %616 = vcosq.f32 %v283_v26 }
  0x71   : > { %618 = vsinq.f32 %v283_v26 }
  0x7d   : > { %v617_v31 = vpop.eup %616 }
  0x7e   : > { %v619_v11 = vpop.eup %618  ;;  %v294_v32 = vxor.u32 2147483648, %v617_v31 }
  0x7f   : > { %v291_v33 = vxor.u32 2147483648, %v619_v11 }
  0x80   : > { %v295_v34 = vsel %vm293_vm9, %v294_v32, %v619_v11  ;;  %v400_v35 = vsel %vm398_vm10, %v294_v32, %v619_v11 }
  0x81   : > { %v292_v36 = vsel %vm290_vm11, %v617_v31, %v291_v33  ;;  %v397_v37 = vsel %vm395_vm12, %v617_v31, %v291_v33 }
  0x82   : > { %v296_v38 = vsel %vm289_vm13, %v292_v36, %v295_v34  ;;  %v401_v39 = vsel %vm394_vm14, %v397_v37, %v400_v35 }
  0x83   : > { %v297_v8 = vsel %vm287_vm15, nan, %v296_v38  ;;  %v402_v40 = vsel %vm287_vm15, nan, %v401_v39 }
  0x84   : > { %298 = vst [vmem:[%s165_s9] sm:$0xff] %v297_v8  ;;  %403 = vst [vmem:[%s172_s11] sm:$0xff] %v402_v40 }
  0x85   : > { %659 = shalt.err (!%p656_p1)
}
  0x86   : > { %s660_s6 = scalar_lea.hbm %s874_s16, 128  ;;  %s664_s11 = scalar_lea.hbm %s942_s2, 256 }
  0x87   : > { %p661_p2 = scmp.ne.s32.totalorder %s874_s16, %s660_s6  ;;  %p665_p7 = scmp.lt.s32.totalorder %s874_s16, %s942_s2 }
  0x88   : > { %p666_p8 = scmp.lt.s32.totalorder %s664_s11, %s660_s6 }
  0x89   : > { %p662_p3 = pnand %p661_p2, %p809_p5 }
  0x8a   : > { %p667_p9 = por %p666_p8, %p665_p7 }
  0x8b   : > { %p663_p4 = pneg %p662_p3 }
  0x8d   : > { %p668_p10 = pnand %p667_p9, %p663_p4 }
  0x8f   : > { %671 = shalt.err (!%p668_p10)
}
  0x90   : > { %559 = dma.vmem_to_hbm [thread:$0]  (%p809_p5), %s867_s10, 128, %s874_s16, %s405_s28  }
  0x91   : > { %s410_s24 = scalar_lea.sflag [#allocation7], %s862_s7  ;;  %s672_s25 = scalar_lea.vmem %s869_s17, 128 }
  0x92   : > { %p673_p11 = scmp.ne.s32.totalorder %s869_s17, %s672_s25  ;;  %s750_s26 = smov [#allocation6]  }
  0x93   : > { %s676_s29 = sshll.u32 %s750_s26, 4  ;;  %s677_s29 = int_to_ptr.vmem [resolvable:$false] %s676_s29 }
  0x94   : > { %p674_p12 = pnand %p673_p11, %p809_p5  ;;  %s678_s30 = scalar_lea.vmem %s677_s29, 256 }
  0x95   : > { %p679_p0 = scmp.lt.s32.totalorder %s869_s17, %s677_s29  ;;  %p680_p1 = scmp.lt.s32.totalorder %s678_s30, %s672_s25 }
  0x96   : > { %p675_p13 = pneg %p674_p12 }
  0x97   : > { %p681_p2 = por %p680_p1, %p679_p0 }
  0x99   : > { %p682_p3 = pnand %p681_p2, %p675_p13 }
  0x9b   : > { %685 = shalt.err (!%p682_p3)
}
  0x9c   : > { %s686_s10 = scalar_lea.hbm %s879_s27, 128  ;;  %s690_s28 = scalar_lea.hbm %s943_s3, 256 }
  0x9d   : > { %p687_p4 = scmp.ne.s32.totalorder %s879_s27, %s686_s10  ;;  %p691_p9 = scmp.lt.s32.totalorder %s879_s27, %s943_s3 }
  0x9e   : > { %p692_p10 = scmp.lt.s32.totalorder %s690_s28, %s686_s10 }
  0x9f   : > { %p688_p7 = pnand %p687_p4, %p809_p5 }
  0xa0   : > { %p693_p11 = por %p692_p10, %p691_p9 }
  0xa1   : > { %p689_p8 = pneg %p688_p7 }
  0xa3   : > { %p694_p12 = pnand %p693_p11, %p689_p8 }
  0xa5   : > { %697 = shalt.err (!%p694_p12)
}
  0xa6   : > { %560 = dma.vmem_to_hbm [thread:$0]  (%p809_p5), %s869_s17, 128, %s879_s27, %s410_s24  }
  0xa7 PF: > { %p576_p13 = scmp.ge.s32.totalorder %s740_s15, 2  ;;  %s448_s6 = sand.u32 1, %s728_s12  }
  0xa8   : > { %s449_s8 = scalar_lea.sflag [#allocation4], %s448_s6 }
  0xa9   : > { %p568_p0 = pnand %p576_p13, %p813_p6 }
  0xab   : > { %p569_p1 = pneg %p568_p0 }
  0xad   : > { %719 = dma.done.wait (%p569_p1), %s449_s8, 128  }
  0xae   : > { %721 = vsyncadd (%p569_p1), %s449_s8, 4294967168  ;;  %s458_s9 = scalar_lea.sflag [#allocation7], %s448_s6 }
  0xaf   : > { %723 = dma.done.wait (%p569_p1), %s458_s9, 128  }
  0xb0   : > { %725 = vsyncadd (%p569_p1), %s458_s9, 4294967168  ;;  %p18_p5 = scmp.ge.s32.totalorder %s796_s18, 4   ;;  %s947_s12 = smov %s732_s13 }
  0xb1   : > { %s948_s13 = smov %s736_s14  ;;  %s949_s14 = smov %s807_s21 }
  0xb2   : > { %s950_s15 = smov %s796_s18  ;;  %20 = sbr.rel (!%p18_p5) target bundleno = 6 (0x6), region = 82 }
  0xb7   :  { %463 = vsyncpa [#allocation3], 1 }
  0xb8   :  { %465 = vsyncpa [#allocation3 + $0x1], 1 }
  0xb9   :  { %466 = vsyncpa [#allocation4], 1 }
  0xba   :  { %468 = vsyncpa [#allocation4 + $0x1], 1 }
  0xbb   :  { %469 = vsyncpa [#allocation7], 1 }
  0xbc   :  { %471 = vsyncpa [#allocation7 + $0x1], 1 }

</bundles_post_ra>
